<compile_context>
chip_gen: v5e
topology: v5e:2x2
jax: 0.10.0
libtpu: 0.0.40
codegen_flags: <defaults>
</compile_context>

<pallas_src>
import jax
import jax.numpy as jnp
from jax.experimental import pallas as pl
from jax.experimental.pallas import tpu as pltpu


ENC_OUT_DIM = 512
LATENT_DIM = 256


def vae_latent_kernel(x_ref, w_ref, b_ref, eps_ref, z_ref, mu_ref, logvar_ref):
    """Fused fc_mu / fc_var + reparameterization (rsample) for one batch tile.

    One bf16 MXU matmul produces [mu | log_var] in a single [tb, 2*latent]
    f32 accumulator; the VPU/EUP then does the exp and the affine rsample.
    """
    x = x_ref[...].astype(jnp.bfloat16)          # activations -> bf16 for MXU
    h = jnp.dot(x, w_ref[...], preferred_element_type=jnp.float32) + b_ref[...]

    mu = h[:, :LATENT_DIM]                       # lane-aligned split (256|256)
    log_var = h[:, LATENT_DIM:]

    std = jnp.exp(log_var * 0.5)                 # EUP transcendental, f32
    z = mu + std * eps_ref[...]                  # reparameterization trick

    z_ref[...] = z
    mu_ref[...] = mu
    logvar_ref[...] = log_var


def vae_latent_head(x_encoded, w_cat, b_cat, eps, *, block_b=256):
    """Wrapper: pads batch to a sublane multiple and tiles it over a 1-D grid."""
    B = x_encoded.shape[0]

    # Sublane-align the batch, then pick a batch tile and pad to a multiple of it.
    b_aligned = ((B + 7) // 8) * 8
    tb = min(block_b, b_aligned)
    b_pad = ((b_aligned + tb - 1) // tb) * tb
    if b_pad != B:
        pad = b_pad - B
        x_encoded = jnp.pad(x_encoded, ((0, pad), (0, 0)))
        eps = jnp.pad(eps, ((0, pad), (0, 0)))

    grid = (b_pad // tb,)
    out_shape = (
        jax.ShapeDtypeStruct((b_pad, LATENT_DIM), jnp.float32),  # z
        jax.ShapeDtypeStruct((b_pad, LATENT_DIM), jnp.float32),  # mu
        jax.ShapeDtypeStruct((b_pad, LATENT_DIM), jnp.float32),  # log_var
    )
    lat_spec = pl.BlockSpec((tb, LATENT_DIM), lambda i: (i, 0))

    z, mu, log_var = pl.pallas_call(
        vae_latent_kernel,
        out_shape=out_shape,
        grid_spec=pltpu.PrefetchScalarGridSpec(
            num_scalar_prefetch=0,
            grid=grid,
            in_specs=[
                pl.BlockSpec((tb, ENC_OUT_DIM), lambda i: (i, 0)),        # x tile
                pl.BlockSpec((ENC_OUT_DIM, 2 * LATENT_DIM), lambda i: (0, 0)),  # W (resident)
                pl.BlockSpec((1, 2 * LATENT_DIM), lambda i: (0, 0)),      # bias (resident)
                lat_spec,                                                  # eps tile
            ],
            out_specs=(lat_spec, lat_spec, lat_spec),
        ),
        compiler_params=pltpu.CompilerParams(
            dimension_semantics=("parallel",),
            vmem_limit_bytes=32 << 20,
        ),
    )(x_encoded, w_cat, b_cat, eps)

    return z[:B], mu[:B], log_var[:B]


def _linear_init(key, fan_in, fan_out):
    """PyTorch nn.Linear default init: U(-1/sqrt(fan_in), 1/sqrt(fan_in)).

    Stored transposed as [in, out] so the kernel computes x @ W directly.
    """
    kw, kb = jax.random.split(key)
    bound = 1.0 / jnp.sqrt(jnp.float32(fan_in))
    w = jax.random.uniform(kw, (fan_in, fan_out), jnp.float32, -bound, bound)
    b = jax.random.uniform(kb, (1, fan_out), jnp.float32, -bound, bound)
    return w, b


def make_params(key):
    k_mu, k_var = jax.random.split(key)
    w_mu, b_mu = _linear_init(k_mu, ENC_OUT_DIM, LATENT_DIM)
    w_var, b_var = _linear_init(k_var, ENC_OUT_DIM, LATENT_DIM)
    # Concatenate fc_mu / fc_var along the output axis: one matmul, one bias.
    w_cat = jnp.concatenate([w_mu, w_var], axis=1).astype(jnp.bfloat16)
    b_cat = jnp.concatenate([b_mu, b_var], axis=1)          # keep bias in f32
    return w_cat, b_cat


def reference_latent_head(x_encoded, w_cat, b_cat, eps):
    """Pure-JAX reference of the same forward pass (same bf16 weight path)."""
    xb = x_encoded.astype(jnp.bfloat16)
    h = jnp.dot(xb, w_cat, preferred_element_type=jnp.float32) + b_cat
    mu = h[:, :LATENT_DIM]
    log_var = h[:, LATENT_DIM:]
    std = jnp.exp(log_var * 0.5)
    z = mu + std * eps
    return z, mu, log_var


if __name__ == "__main__":
    key = jax.random.PRNGKey(0)
    k_x, k_p, k_eps = jax.random.split(key, 3)

    B = 4  # small batch; encoder output dim = 512, latent dim = 256
    x_encoded = jax.random.normal(k_x, (B, ENC_OUT_DIM), jnp.float32)
    eps = jax.random.normal(k_eps, (B, LATENT_DIM), jnp.float32)
    w_cat, b_cat = make_params(k_p)

    z, mu, log_var = vae_latent_head(x_encoded, w_cat, b_cat, eps)
    z = jax.block_until_ready(z)

    z_ref, mu_ref, lv_ref = reference_latent_head(x_encoded, w_cat, b_cat, eps)

    assert z.shape == (B, LATENT_DIM)
    assert mu.shape == (B, LATENT_DIM)
    assert log_var.shape == (B, LATENT_DIM)
    # bf16 weight/activation path -> tolerance loosened vs pure-f32.
    assert jnp.allclose(mu, mu_ref, atol=1e-2, rtol=1e-2)
    assert jnp.allclose(log_var, lv_ref, atol=1e-2, rtol=1e-2)
    assert jnp.allclose(z, z_ref, atol=1e-2, rtol=1e-2)

    print("KERNEL_OK")
</pallas_src>

<mosaic_0001>
module attributes {stable_mosaic.version = 11 : i64} {
  func.func @vae_latent_kernel(%arg0: i32, %arg1: memref<8x512xf32, #tpu.memory_space<vmem>>, %arg2: memref<512x512xbf16, #tpu.memory_space<vmem>>, %arg3: memref<1x512xf32, #tpu.memory_space<vmem>>, %arg4: memref<8x256xf32, #tpu.memory_space<vmem>>, %arg5: memref<8x256xf32, #tpu.memory_space<vmem>>, %arg6: memref<8x256xf32, #tpu.memory_space<vmem>>, %arg7: memref<8x256xf32, #tpu.memory_space<vmem>>) attributes {dimension_semantics = [#tpu.dimension_semantics<parallel>], iteration_bounds = array<i64: 1>, scalar_prefetch = 0 : i64, scratch_operands = 0 : i64, tpu.core_type = #tpu.core_type<tc>, window_params = [{transform_indices = @transform_0, window_bounds = array<i64: 8, 512>}, {pipeline_mode = #tpu.pipeline_mode<synchronous>, transform_indices = @transform_1, window_bounds = array<i64: 512, 512>}, {pipeline_mode = #tpu.pipeline_mode<synchronous>, transform_indices = @transform_2, window_bounds = array<i64: 1, 512>}, {transform_indices = @transform_3, window_bounds = array<i64: 8, 256>}, {transform_indices = @transform_4, window_bounds = array<i64: 8, 256>}, {transform_indices = @transform_5, window_bounds = array<i64: 8, 256>}, {transform_indices = @transform_6, window_bounds = array<i64: 8, 256>}]} {
    %c0 = arith.constant 0 : index
    %c0_0 = arith.constant 0 : index
    %0 = vector.load %arg1[%c0, %c0_0] : memref<8x512xf32, #tpu.memory_space<vmem>>, vector<8x512xf32>
    %1 = arith.truncf %0 : vector<8x512xf32> to vector<8x512xbf16>
    %c0_1 = arith.constant 0 : index
    %c0_2 = arith.constant 0 : index
    %2 = vector.load %arg2[%c0_1, %c0_2] : memref<512x512xbf16, #tpu.memory_space<vmem>>, vector<512x512xbf16>
    %cst = arith.constant dense<0.000000e+00> : vector<8x512xf32>
    %3 = tpu.matmul %1, %2, %cst {dimension_numbers = #tpu.dot_dimension_numbers<[1], [0], [0], [1], [0, 0, 1, 1], [], []>} : vector<8x512xbf16>, vector<512x512xbf16>, vector<8x512xf32> -> vector<8x512xf32>
    %c0_3 = arith.constant 0 : index
    %c0_4 = arith.constant 0 : index
    %4 = vector.load %arg3[%c0_3, %c0_4] : memref<1x512xf32, #tpu.memory_space<vmem>>, vector<1x512xf32>
    %5 = vector.broadcast %4 : vector<1x512xf32> to vector<8x512xf32>
    %6 = arith.addf %3, %5 : vector<8x512xf32>
    %7 = vector.extract_strided_slice %6 {offsets = [0, 0], sizes = [8, 256], strides = [1, 1]} : vector<8x512xf32> to vector<8x256xf32>
    %8 = vector.extract_strided_slice %6 {offsets = [0, 256], sizes = [8, 256], strides = [1, 1]} : vector<8x512xf32> to vector<8x256xf32>
    %cst_5 = arith.constant 5.000000e-01 : f32
    %9 = vector.broadcast %cst_5 : f32 to vector<8x256xf32>
    %10 = arith.mulf %8, %9 : vector<8x256xf32>
    %11 = math.exp %10 : vector<8x256xf32>
    %c0_6 = arith.constant 0 : index
    %c0_7 = arith.constant 0 : index
    %12 = vector.load %arg4[%c0_6, %c0_7] : memref<8x256xf32, #tpu.memory_space<vmem>>, vector<8x256xf32>
    %13 = arith.mulf %11, %12 : vector<8x256xf32>
    %14 = arith.addf %7, %13 : vector<8x256xf32>
    %c0_8 = arith.constant 0 : index
    %c0_9 = arith.constant 0 : index
    %15 = vector.load %arg5[%c0_8, %c0_9] : memref<8x256xf32, #tpu.memory_space<vmem>>, vector<8x256xf32>
    tpu.vector_store %arg5[%c0_8, %c0_9], %14 {strides = array<i32>} : memref<8x256xf32, #tpu.memory_space<vmem>>, vector<8x256xf32>,
    %c0_10 = arith.constant 0 : index
    %c0_11 = arith.constant 0 : index
    %16 = vector.load %arg6[%c0_10, %c0_11] : memref<8x256xf32, #tpu.memory_space<vmem>>, vector<8x256xf32>
    tpu.vector_store %arg6[%c0_10, %c0_11], %7 {strides = array<i32>} : memref<8x256xf32, #tpu.memory_space<vmem>>, vector<8x256xf32>,
    %c0_12 = arith.constant 0 : index
    %c0_13 = arith.constant 0 : index
    %17 = vector.load %arg7[%c0_12, %c0_13] : memref<8x256xf32, #tpu.memory_space<vmem>>, vector<8x256xf32>
    tpu.vector_store %arg7[%c0_12, %c0_13], %8 {strides = array<i32>} : memref<8x256xf32, #tpu.memory_space<vmem>>, vector<8x256xf32>,
    return
  }
  func.func @transform_0(%arg0: i32) -> (i32, i32) {
    %c0_i32 = arith.constant 0 : i32
    %c0_i32_0 = arith.constant 0 : i32
    return %arg0, %c0_i32 : i32, i32
  }
  func.func @transform_1(%arg0: i32) -> (i32, i32) {
    %c0_i32 = arith.constant 0 : i32
    %c0_i32_0 = arith.constant 0 : i32
    %c0_i32_1 = arith.constant 0 : i32
    return %c0_i32, %c0_i32_0 : i32, i32
  }
  func.func @transform_2(%arg0: i32) -> (i32, i32) {
    %c0_i32 = arith.constant 0 : i32
    %c0_i32_0 = arith.constant 0 : i32
    %c0_i32_1 = arith.constant 0 : i32
    return %c0_i32, %c0_i32_0 : i32, i32
  }
  func.func @transform_3(%arg0: i32) -> (i32, i32) {
    %c0_i32 = arith.constant 0 : i32
    %c0_i32_0 = arith.constant 0 : i32
    return %arg0, %c0_i32 : i32, i32
  }
  func.func @transform_4(%arg0: i32) -> (i32, i32) {
    %c0_i32 = arith.constant 0 : i32
    %c0_i32_0 = arith.constant 0 : i32
    return %arg0, %c0_i32 : i32, i32
  }
  func.func @transform_5(%arg0: i32) -> (i32, i32) {
    %c0_i32 = arith.constant 0 : i32
    %c0_i32_0 = arith.constant 0 : i32
    return %arg0, %c0_i32 : i32, i32
  }
  func.func @transform_6(%arg0: i32) -> (i32, i32) {
    %c0_i32 = arith.constant 0 : i32
    %c0_i32_0 = arith.constant 0 : i32
    return %arg0, %c0_i32 : i32, i32
  }
}

</mosaic_0001>

<bundles_post_ra>
// kernel: tpu_custom_call.1
= control target key start
LH: loop header
LB: loop body
LE: loop exit
PB: predicated region body
PF: predicated region fallthrough
CT: control target
= control target key end

     0   :  { %12 = vsyncpa [#allocation3], 0  ;;  %s2061_s0 = inlined_call_operand.hbm [shape: f32[8,512], index: 0, kind: input, shape index: {}]   ;;  %s2062_s1 = inlined_call_operand.hbm [shape: bf16[512,512], index: 1, kind: input, shape index: {}]   ;;  %s2063_s2 = inlined_call_operand.hbm [shape: f32[1,512], index: 2, kind: input, shape index: {}]   ;;  %s2064_s3 = inlined_call_operand.hbm [shape: f32[8,256], index: 3, kind: input, shape index: {}]   ;;  %s2065_s4 = inlined_call_operand.hbm [shape: f32[8,256], index: 4, kind: output, shape index: {0}]   ;;  %s2066_s5 = inlined_call_operand.hbm [shape: f32[8,256], index: 5, kind: output, shape index: {1}]   ;;  %s2067_s6 = inlined_call_operand.hbm [shape: f32[8,256], index: 6, kind: output, shape index: {2}]  }
   0x1   :  { %13 = vsyncpa [#allocation6], 0 }
   0x2   :  { %14 = vsyncpa [#allocation9], 0 }
   0x3   :  { %15 = vsyncpa [#allocation4], 0  ;;  %s32_s23 = sshll.u32 %s2062_s1, 4  ;;  %s33_s23 = int_to_ptr.hbm [resolvable:$true] %s32_s23 }
   0x4   :  { %16 = vsyncpa [#allocation12], 0  ;;  %s1972_s24 = smov [#allocation5]   ;;  %s22_s28 = sshll.u32 %s2061_s0, 4  ;;  %s23_s28 = int_to_ptr.hbm [resolvable:$true] %s22_s28 }
   0x5   :  { %s34_s25 = sshll.u32 %s1972_s24, 4  ;;  %s1973_s29 = smov 256   ;;  %s35_s25 = int_to_ptr.vmem [resolvable:$true] %s34_s25 }
   0x6   :  { %s1974_s30 = smov 16   ;;  %s1975_s7 = smov [#allocation2]  }
   0x7   :  { %40 = dma.hbm_to_vmem [thread:$0]  %s33_s23, 16384, %s35_s25, [#allocation6], %s1973_s29, %s1973_s29, %s1974_s30  }
   0x8   :  { %s24_s8 = sshll.u32 %s1975_s7, 4  ;;  %s46_s11 = sshll.u32 %s2063_s2, 4  ;;  %s25_s8 = int_to_ptr.vmem [resolvable:$true] %s24_s8  ;;  %s47_s11 = int_to_ptr.hbm [resolvable:$true] %s46_s11 }
   0x9   :  { %27 = dma.hbm_to_vmem [thread:$0]  %s23_s28, 512, %s25_s8, [#allocation3]  }
   0xa   :  { %s57_s13 = sshll.u32 %s2064_s3, 4  ;;  %s1976_s14 = smov [#allocation7]   ;;  %s58_s13 = int_to_ptr.hbm [resolvable:$true] %s57_s13 }
   0xb   :  { %s48_s15 = sshll.u32 %s1976_s14, 4  ;;  %s1977_s0 = smov [#allocation8]   ;;  %s49_s15 = int_to_ptr.vmem [resolvable:$true] %s48_s15 }
   0xc   :  { %51 = dma.hbm_to_vmem [thread:$0]  %s47_s11, 64, %s49_s15, [#allocation6]  }
   0xd   :  { %s59_s16 = sshll.u32 %s1977_s0, 4  ;;  %s60_s16 = int_to_ptr.vmem [resolvable:$true] %s59_s16 }
   0xe   :  { %62 = dma.hbm_to_vmem [thread:$0]  %s58_s13, 256, %s60_s16, [#allocation9]  }
   0xf   :  { %1962 = dma.done.wait [#allocation3], 512  }
  0x10   :  { %1963 = vsyncadd [#allocation3], 4294966784 }
  0x11   :  { %1964 = dma.done.wait [#allocation6], 16448  }
  0x12   :  { %1965 = vsyncadd [#allocation6], 4294950848 }
  0x13   :  { %1966 = dma.done.wait [#allocation9], 256  }
  0x14   :  { %1967 = vsyncadd [#allocation9], 4294967040  ;;  %v1255_v0 = vld [vmem:[#allocation5 + $0xe0] sm:$0xf]  ;;  %v1683_v1 = vld [vmem:[#allocation5 + $0xec] sm:$0xf0] }
  0x15   :  { %v1383_v2 = vld [vmem:[#allocation5 + $0x1e0] sm:$0xf]  ;;  %v1256_v3 = vor.u32 %v1683_v1, %v1255_v0  ;;  %v1715_v4 = vld [vmem:[#allocation5 + $0x1ec] sm:$0xf0]  ;;  %s1978_s2 = smov [#allocation11]   ;;  %s1109_s19 = sshll.u32 %s2066_s5, 4  ;;  %s1110_s19 = int_to_ptr.hbm [resolvable:$true] %s1109_s19 }
  0x16   :  { %v1511_v5 = vld [vmem:[#allocation5 + $0x2e0] sm:$0xf]  ;;  %v1747_v6 = vld [vmem:[#allocation5 + $0x2ec] sm:$0xf0]  ;;  %v1384_v7 = vor.u32 %v1715_v4, %v1383_v2  ;;  %s1107_s3 = sshll.u32 %s1978_s2, 4  ;;  %s1979_s5 = smov [#allocation13]   ;;  %s1108_s3 = int_to_ptr.vmem [resolvable:$true] %s1107_s3 }
  0x17   :  { %v1512_v8 = vor.u32 %v1747_v6, %v1511_v5  ;;  %v1639_v9 = vld [vmem:[#allocation5 + $0x3e0] sm:$0xf]  ;;  %v1779_v10 = vld [vmem:[#allocation5 + $0x3ec] sm:$0xf0]  ;;  %865 = vmatpush.bf16.msra.mxu0 %v1256_v3  ;;  %s1118_s20 = sshll.u32 %s1979_s5, 4  ;;  %s1120_s23 = sshll.u32 %s2067_s6, 4  ;;  %s1119_s20 = int_to_ptr.vmem [resolvable:$true] %s1118_s20  ;;  %s1121_s23 = int_to_ptr.hbm [resolvable:$true] %s1120_s23 }
  0x18   :  { %v1239_v11 = vld [vmem:[#allocation5 + $0xc0] sm:$0xf]  ;;  %v1640_v12 = vor.u32 %v1779_v10, %v1639_v9  ;;  %v1679_v13 = vld [vmem:[#allocation5 + $0xcc] sm:$0xf0]  ;;  %878 = vmatpush.bf16.msra.mxu1 %v1384_v7  ;;  %s1980_s24 = smov [#allocation10]   ;;  %s1098_s27 = sshll.u32 %s2065_s4, 4  ;;  %s1099_s27 = int_to_ptr.hbm [resolvable:$true] %s1098_s27 }
  0x19   :  { %v1367_v14 = vld [vmem:[#allocation5 + $0x1c0] sm:$0xf]  ;;  %v1711_v15 = vld [vmem:[#allocation5 + $0x1cc] sm:$0xf0]  ;;  %891 = vmatpush.bf16.msra.mxu2 %v1512_v8  ;;  %v1240_v16 = vor.u32 %v1679_v13, %v1239_v11  ;;  %s1096_s25 = sshll.u32 %s1980_s24, 4  ;;  %s1097_s25 = int_to_ptr.vmem [resolvable:$true] %s1096_s25 }
  0x1a   :  { %v1368_v17 = vor.u32 %v1711_v15, %v1367_v14  ;;  %v1495_v18 = vld [vmem:[#allocation5 + $0x2c0] sm:$0xf]  ;;  %v1743_v19 = vld [vmem:[#allocation5 + $0x2cc] sm:$0xf0]  ;;  %904 = vmatpush.bf16.msra.mxu3 %v1640_v12 }
  0x1b   :  { %v1623_v20 = vld [vmem:[#allocation5 + $0x3c0] sm:$0xf]  ;;  %v1496_v21 = vor.u32 %v1743_v19, %v1495_v18  ;;  %v1775_v22 = vld [vmem:[#allocation5 + $0x3cc] sm:$0xf0]  ;;  %866 = vmatpush.bf16.msra.mxu0 %v1240_v16 }
  0x1c   :  { %v1223_v23 = vld [vmem:[#allocation5 + $0xa0] sm:$0xf]  ;;  %v1675_v24 = vld [vmem:[#allocation5 + $0xac] sm:$0xf0]  ;;  %v1624_v25 = vor.u32 %v1775_v22, %v1623_v20  ;;  %879 = vmatpush.bf16.msra.mxu1 %v1368_v17 }
  0x1d   :  { %v1351_v26 = vld [vmem:[#allocation5 + $0x1a0] sm:$0xf]  ;;  %v1707_v27 = vld [vmem:[#allocation5 + $0x1ac] sm:$0xf0]  ;;  %v1224_v29 = vor.u32 %v1675_v24, %v1223_v23  ;;  %892 = vmatpush.bf16.msra.mxu2 %v1496_v21 }
  0x1e   :  { %v1479_v28 = vld [vmem:[#allocation5 + $0x2a0] sm:$0xf]  ;;  %v1739_v30 = vld [vmem:[#allocation5 + $0x2ac] sm:$0xf0]  ;;  %v1352_v33 = vor.u32 %v1707_v27, %v1351_v26  ;;  %905 = vmatpush.bf16.msra.mxu3 %v1624_v25 }
  0x1f   :  { %v1607_v31 = vld [vmem:[#allocation5 + $0x3a0] sm:$0xf]  ;;  %v1771_v32 = vld [vmem:[#allocation5 + $0x3ac] sm:$0xf0]  ;;  %v1480_v34 = vor.u32 %v1739_v30, %v1479_v28  ;;  %867 = vmatpush.bf16.msra.mxu0 %v1224_v29  ;;  %v1681_v28 = vld [vmem:[#allocation5 + $0xe4] sm:$0xf] }
  0x20   :  { %v1207_v35 = vld [vmem:[#allocation5 + $0x80] sm:$0xf]  ;;  %v1671_v36 = vld [vmem:[#allocation5 + $0x8c] sm:$0xf0]  ;;  %v1608_v38 = vor.u32 %v1771_v32, %v1607_v31  ;;  %880 = vmatpush.bf16.msra.mxu1 %v1352_v33  ;;  %v1257_v29 = vld [vmem:[#allocation5 + $0xf0] sm:$0xf0] }
  0x21   :  { %v1335_v37 = vld [vmem:[#allocation5 + $0x180] sm:$0xf]  ;;  %v1703_v39 = vld [vmem:[#allocation5 + $0x18c] sm:$0xf0]  ;;  %v1208_v44 = vor.u32 %v1671_v36, %v1207_v35  ;;  %893 = vmatpush.bf16.msra.mxu2 %v1480_v34  ;;  %v1713_v30 = vld [vmem:[#allocation5 + $0x1e4] sm:$0xf] }
  0x22   :  { %v1463_v40 = vld [vmem:[#allocation5 + $0x280] sm:$0xf]  ;;  %v1735_v41 = vld [vmem:[#allocation5 + $0x28c] sm:$0xf0]  ;;  %v1336_v45 = vor.u32 %v1703_v39, %v1335_v37  ;;  %906 = vmatpush.bf16.msra.mxu3 %v1608_v38  ;;  %v1385_v32 = vld [vmem:[#allocation5 + $0x1f0] sm:$0xf0] }
  0x23   :  { %v1591_v42 = vld [vmem:[#allocation5 + $0x380] sm:$0xf]  ;;  %v1767_v43 = vld [vmem:[#allocation5 + $0x38c] sm:$0xf0]  ;;  %v1464_v46 = vor.u32 %v1735_v41, %v1463_v40  ;;  %868 = vmatpush.bf16.msra.mxu0 %v1208_v44  ;;  %v1745_v33 = vld [vmem:[#allocation5 + $0x2e4] sm:$0xf]  ;;  %v1260_v40 = vor.u32 %v1681_v28, %v1257_v29  ;;  %v1388_v41 = vor.u32 %v1713_v30, %v1385_v32 }
  0x24   :  { %v1191_v47 = vld [vmem:[#allocation5 + $0x60] sm:$0xf]  ;;  %v1667_v48 = vld [vmem:[#allocation5 + $0x6c] sm:$0xf0]  ;;  %v1592_v50 = vor.u32 %v1767_v43, %v1591_v42  ;;  %881 = vmatpush.bf16.msra.mxu1 %v1336_v45  ;;  %v1513_v34 = vld [vmem:[#allocation5 + $0x2f0] sm:$0xf0] }
  0x25   :  { %v1319_v49 = vld [vmem:[#allocation5 + $0x160] sm:$0xf]  ;;  %v1699_v51 = vld [vmem:[#allocation5 + $0x16c] sm:$0xf0]  ;;  %v1192_v56 = vor.u32 %v1667_v48, %v1191_v47  ;;  %894 = vmatpush.bf16.msra.mxu2 %v1464_v46  ;;  %v1777_v37 = vld [vmem:[#allocation5 + $0x3e4] sm:$0xf]  ;;  %v1516_v42 = vor.u32 %v1745_v33, %v1513_v34 }
  0x26   :  { %v1447_v52 = vld [vmem:[#allocation5 + $0x260] sm:$0xf]  ;;  %v1731_v53 = vld [vmem:[#allocation5 + $0x26c] sm:$0xf0]  ;;  %v1320_v57 = vor.u32 %v1699_v51, %v1319_v49  ;;  %907 = vmatpush.bf16.msra.mxu3 %v1592_v50  ;;  %v1641_v38 = vld [vmem:[#allocation5 + $0x3f0] sm:$0xf0] }
  0x27   :  { %v1575_v54 = vld [vmem:[#allocation5 + $0x360] sm:$0xf]  ;;  %v1763_v55 = vld [vmem:[#allocation5 + $0x36c] sm:$0xf0]  ;;  %v1448_v58 = vor.u32 %v1731_v53, %v1447_v52  ;;  %869 = vmatpush.bf16.msra.mxu0 %v1192_v56  ;;  %v1677_v43 = vld [vmem:[#allocation5 + $0xc4] sm:$0xf]  ;;  %v1644_v46 = vor.u32 %v1777_v37, %v1641_v38 }
  0x28   :  { %v1175_v59 = vld [vmem:[#allocation5 + $0x40] sm:$0xf]  ;;  %v1663_v60 = vld [vmem:[#allocation5 + $0x4c] sm:$0xf0]  ;;  %v1576_v62 = vor.u32 %v1763_v55, %v1575_v54  ;;  %882 = vmatpush.bf16.msra.mxu1 %v1320_v57  ;;  %v1241_v44 = vld [vmem:[#allocation5 + $0xd0] sm:$0xf0] }
  0x29   :  { %v1303_v61 = vld [vmem:[#allocation5 + $0x140] sm:$0xf]  ;;  %v1695_v63 = vld [vmem:[#allocation5 + $0x14c] sm:$0xf0]  ;;  %v1176_v4 = vor.u32 %v1663_v60, %v1175_v59  ;;  %895 = vmatpush.bf16.msra.mxu2 %v1448_v58  ;;  %v1709_v45 = vld [vmem:[#allocation5 + $0x1c4] sm:$0xf]  ;;  %v1244_v52 = vor.u32 %v1677_v43, %v1241_v44 }
  0x2a   :  { %v1431_v0 = vld [vmem:[#allocation5 + $0x240] sm:$0xf]  ;;  %v1727_v1 = vld [vmem:[#allocation5 + $0x24c] sm:$0xf0]  ;;  %v1304_v5 = vor.u32 %v1695_v63, %v1303_v61  ;;  %908 = vmatpush.bf16.msra.mxu3 %v1576_v62  ;;  %v1369_v47 = vld [vmem:[#allocation5 + $0x1d0] sm:$0xf0] }
  0x2b   :  { %v1559_v2 = vld [vmem:[#allocation5 + $0x340] sm:$0xf]  ;;  %v1759_v3 = vld [vmem:[#allocation5 + $0x34c] sm:$0xf0]  ;;  %v1432_v6 = vor.u32 %v1727_v1, %v1431_v0  ;;  %870 = vmatpush.bf16.msra.mxu0 %v1176_v4  ;;  %v1741_v48 = vld [vmem:[#allocation5 + $0x2c4] sm:$0xf]  ;;  %v1372_v54 = vor.u32 %v1709_v45, %v1369_v47 }
  0x2c   :  { %v1159_v7 = vld [vmem:[#allocation5 + $0x20] sm:$0xf]  ;;  %v1659_v8 = vld [vmem:[#allocation5 + $0x2c] sm:$0xf0]  ;;  %v1560_v10 = vor.u32 %v1759_v3, %v1559_v2  ;;  %883 = vmatpush.bf16.msra.mxu1 %v1304_v5  ;;  %v1497_v49 = vld [vmem:[#allocation5 + $0x2d0] sm:$0xf0] }
  0x2d   :  { %v1287_v9 = vld [vmem:[#allocation5 + $0x120] sm:$0xf]  ;;  %v1691_v11 = vld [vmem:[#allocation5 + $0x12c] sm:$0xf0]  ;;  %v1160_v16 = vor.u32 %v1659_v8, %v1159_v7  ;;  %896 = vmatpush.bf16.msra.mxu2 %v1432_v6  ;;  %v1773_v50 = vld [vmem:[#allocation5 + $0x3c4] sm:$0xf]  ;;  %v1500_v55 = vor.u32 %v1741_v48, %v1497_v49 }
  0x2e   :  { %v1415_v12 = vld [vmem:[#allocation5 + $0x220] sm:$0xf]  ;;  %v1723_v13 = vld [vmem:[#allocation5 + $0x22c] sm:$0xf0]  ;;  %v1288_v19 = vor.u32 %v1691_v11, %v1287_v9  ;;  %909 = vmatpush.bf16.msra.mxu3 %v1560_v10  ;;  %v1625_v51 = vld [vmem:[#allocation5 + $0x3d0] sm:$0xf0] }
  0x2f   :  { %v1543_v14 = vld [vmem:[#allocation5 + $0x320] sm:$0xf]  ;;  %v1755_v15 = vld [vmem:[#allocation5 + $0x32c] sm:$0xf0]  ;;  %v1416_v20 = vor.u32 %v1723_v13, %v1415_v12  ;;  %871 = vmatpush.bf16.msra.mxu0 %v1160_v16  ;;  %v1673_v53 = vld [vmem:[#allocation5 + $0xa4] sm:$0xf]  ;;  %v1628_v59 = vor.u32 %v1773_v50, %v1625_v51 }
  0x30   :  { %v1143_v17 = vld [vmem:[#allocation5] sm:$0xf]  ;;  %v1655_v18 = vld [vmem:[#allocation5 + $0xc] sm:$0xf0]  ;;  %v1544_v24 = vor.u32 %v1755_v15, %v1543_v14  ;;  %884 = vmatpush.bf16.msra.mxu1 %v1288_v19  ;;  %v1225_v56 = vld [vmem:[#allocation5 + $0xb0] sm:$0xf0] }
  0x31   :  { %v1271_v21 = vld [vmem:[#allocation5 + $0x100] sm:$0xf]  ;;  %v1687_v22 = vld [vmem:[#allocation5 + $0x10c] sm:$0xf0]  ;;  %v1144_v31 = vor.u32 %v1655_v18, %v1143_v17  ;;  %897 = vmatpush.bf16.msra.mxu2 %v1416_v20  ;;  %v1705_v57 = vld [vmem:[#allocation5 + $0x1a4] sm:$0xf]  ;;  %v1228_v0 = vor.u32 %v1673_v53, %v1225_v56 }
  0x32   :  { %v1399_v23 = vld [vmem:[#allocation5 + $0x200] sm:$0xf]  ;;  %v1719_v25 = vld [vmem:[#allocation5 + $0x20c] sm:$0xf0]  ;;  %v1272_v35 = vor.u32 %v1687_v22, %v1271_v21  ;;  %910 = vmatpush.bf16.msra.mxu3 %v1544_v24  ;;  %v1353_v58 = vld [vmem:[#allocation5 + $0x1b0] sm:$0xf0] }
  0x33   :  { %v1527_v26 = vld [vmem:[#allocation5 + $0x300] sm:$0xf]  ;;  %v1751_v27 = vld [vmem:[#allocation5 + $0x30c] sm:$0xf0]  ;;  %v1400_v36 = vor.u32 %v1719_v25, %v1399_v23  ;;  %872 = vmatpush.bf16.msra.mxu0 %v1144_v31  ;;  %v1737_v60 = vld [vmem:[#allocation5 + $0x2a4] sm:$0xf]  ;;  %v1356_v1 = vor.u32 %v1705_v57, %v1353_v58 }
  0x34   :  { %v1528_v39 = vor.u32 %v1751_v27, %v1527_v26  ;;  %885 = vmatpush.bf16.msra.mxu1 %v1272_v35  ;;  %v1481_v61 = vld [vmem:[#allocation5 + $0x2b0] sm:$0xf0]  ;;  %v1769_v62 = vld [vmem:[#allocation5 + $0x3a4] sm:$0xf]  ;;  %v82_v10 = vld [vmem:[#allocation2 + $0x18] sm:$0xff] }
  0x35   :  { %898 = vmatpush.bf16.msra.mxu2 %v1400_v36  ;;  %v1609_v63 = vld [vmem:[#allocation5 + $0x3b0] sm:$0xf0]  ;;  %v1669_v2 = vld [vmem:[#allocation5 + $0x84] sm:$0xf]  ;;  %v1484_v5 = vor.u32 %v1737_v60, %v1481_v61  ;;  %v2032_v15 = vpack.c.bf16 %v82_v10, %v82_v10  ;;  %v80_v19 = vld [vmem:[#allocation2 + $0x8] sm:$0xff] }
  0x36   :  { %911 = vmatpush.bf16.msra.mxu3 %v1528_v39  ;;  %v81_v3 = vld [vmem:[#allocation2 + $0x10] sm:$0xff]  ;;  %v79_v4 = vld [vmem:[#allocation2] sm:$0xff]  ;;  %v1612_v11 = vor.u32 %v1769_v62, %v1609_v63  ;;  %v2037_v25 = vpack.c.bf16 %v80_v19, %v80_v19  ;;  %v1716_v10 = vld [vmem:[#allocation5 + $0x1f4] sm:$0xf0] }
  0x37   :  { %917 = vmatpush.bf16.msrb.mxu0 %v1260_v40  ;;  %v1209_v6 = vld [vmem:[#allocation5 + $0x90] sm:$0xf0]  ;;  %v1701_v7 = vld [vmem:[#allocation5 + $0x184] sm:$0xf]  ;;  %v2028_v8 = vpack.c.bf16 %v81_v3, %v81_v3  ;;  %v2030_v9 = vpack.c.bf16 %v79_v4, %v79_v4  ;;  %v1263_v4 = vld [vmem:[#allocation5 + $0xe8] sm:$0xf] }
  0x38   :  { %930 = vmatpush.bf16.msrb.mxu1 %v1388_v41  ;;  %v1337_v12 = vld [vmem:[#allocation5 + $0x190] sm:$0xf0]  ;;  %v1733_v13 = vld [vmem:[#allocation5 + $0x284] sm:$0xf]  ;;  %v1212_v18 = vor.u32 %v1669_v2, %v1209_v6  ;;  %v1391_v6 = vld [vmem:[#allocation5 + $0x1e8] sm:$0xf] }
  0x39   :  { %943 = vmatpush.bf16.msrb.mxu2 %v1516_v42  ;;  %v1465_v14 = vld [vmem:[#allocation5 + $0x290] sm:$0xf0]  ;;  %v1765_v16 = vld [vmem:[#allocation5 + $0x384] sm:$0xf]  ;;  %873 = vmatmul.bf16.vlgmr.msra.gmra.mxu0 %v2030_v9  ;;  %v1340_v20 = vor.u32 %v1701_v7, %v1337_v12  ;;  %v1748_v12 = vld [vmem:[#allocation5 + $0x2f4] sm:$0xf0] }
  0x3a   :  { %956 = vmatpush.bf16.msrb.mxu3 %v1644_v46  ;;  %v1593_v17 = vld [vmem:[#allocation5 + $0x390] sm:$0xf0]  ;;  %899 = vmatmul.bf16.vlgmr.msra.gmra.mxu2 %v2028_v8  ;;  %v1468_v21 = vor.u32 %v1733_v13, %v1465_v14  ;;  %v1665_v22 = vld [vmem:[#allocation5 + $0x64] sm:$0xf] }
  0x3b   :  { %918 = vmatpush.bf16.msrb.mxu0 %v1244_v52  ;;  %912 = vmatmul.bf16.vlgmr.msra.gmra.mxu3 %v2032_v15  ;;  %v1193_v23 = vld [vmem:[#allocation5 + $0x70] sm:$0xf0]  ;;  %v1697_v24 = vld [vmem:[#allocation5 + $0x164] sm:$0xf]  ;;  %v1596_v26 = vor.u32 %v1765_v16, %v1593_v17  ;;  %v1647_v16 = vld [vmem:[#allocation5 + $0x3e8] sm:$0xf] }
  0x3c   :  { %931 = vmatpush.bf16.msrb.mxu1 %v1372_v54  ;;  %v1321_v27 = vld [vmem:[#allocation5 + $0x170] sm:$0xf0]  ;;  %v1729_v28 = vld [vmem:[#allocation5 + $0x264] sm:$0xf]  ;;  %v1196_v32 = vor.u32 %v1665_v22, %v1193_v23  ;;  %v1780_v17 = vld [vmem:[#allocation5 + $0x3f4] sm:$0xf0] }
  0x3d   :  { %944 = vmatpush.bf16.msrb.mxu2 %v1500_v55  ;;  %v1449_v29 = vld [vmem:[#allocation5 + $0x270] sm:$0xf0]  ;;  %v1761_v30 = vld [vmem:[#allocation5 + $0x364] sm:$0xf]  ;;  %886 = vmatmul.bf16.vlgmr.msra.gmra.mxu1 %v2037_v25  ;;  %v1324_v33 = vor.u32 %v1697_v24, %v1321_v27  ;;  %v1247_v22 = vld [vmem:[#allocation5 + $0xc8] sm:$0xf] }
  0x3e   :  { %957 = vmatpush.bf16.msrb.mxu3 %v1628_v59  ;;  %v1577_v31 = vld [vmem:[#allocation5 + $0x370] sm:$0xf0]  ;;  %v1452_v34 = vor.u32 %v1729_v28, %v1449_v29  ;;  %v1661_v35 = vld [vmem:[#allocation5 + $0x44] sm:$0xf]  ;;  %v1680_v23 = vld [vmem:[#allocation5 + $0xd4] sm:$0xf0] }
  0x3f   :  { %919 = vmatpush.bf16.msrb.mxu0 %v1228_v0  ;;  %v1177_v36 = vld [vmem:[#allocation5 + $0x50] sm:$0xf0]  ;;  %v1693_v37 = vld [vmem:[#allocation5 + $0x144] sm:$0xf]  ;;  %v1580_v38 = vor.u32 %v1761_v30, %v1577_v31  ;;  %v1375_v24 = vld [vmem:[#allocation5 + $0x1c8] sm:$0xf] }
  0x40   :  { %932 = vmatpush.bf16.msrb.mxu1 %v1356_v1  ;;  %v1305_v39 = vld [vmem:[#allocation5 + $0x150] sm:$0xf0]  ;;  %v1725_v40 = vld [vmem:[#allocation5 + $0x244] sm:$0xf]  ;;  %v1180_v44 = vor.u32 %v1661_v35, %v1177_v36  ;;  %v1712_v27 = vld [vmem:[#allocation5 + $0x1d4] sm:$0xf0] }
  0x41   :  { %945 = vmatpush.bf16.msrb.mxu2 %v1484_v5  ;;  %v1433_v41 = vld [vmem:[#allocation5 + $0x250] sm:$0xf0]  ;;  %v1757_v42 = vld [vmem:[#allocation5 + $0x344] sm:$0xf]  ;;  %v1308_v45 = vor.u32 %v1693_v37, %v1305_v39  ;;  %v1684_v5 = vld [vmem:[#allocation5 + $0xf4] sm:$0xf0] }
  0x42   :  { %958 = vmatpush.bf16.msrb.mxu3 %v1612_v11  ;;  %v1561_v43 = vld [vmem:[#allocation5 + $0x350] sm:$0xf0]  ;;  %v1436_v46 = vor.u32 %v1725_v40, %v1433_v41  ;;  %v1657_v47 = vld [vmem:[#allocation5 + $0x24] sm:$0xf]  ;;  %v1519_v11 = vld [vmem:[#allocation5 + $0x2e8] sm:$0xf]  ;;  %v1264_v19 = vor.u32 %v1684_v5, %v1263_v4 }
  0x43   :  { %920 = vmatpush.bf16.msrb.mxu0 %v1212_v18  ;;  %v1161_v48 = vld [vmem:[#allocation5 + $0x30] sm:$0xf0]  ;;  %v1689_v49 = vld [vmem:[#allocation5 + $0x124] sm:$0xf]  ;;  %v1564_v50 = vor.u32 %v1757_v42, %v1561_v43  ;;  %v1503_v28 = vld [vmem:[#allocation5 + $0x2c8] sm:$0xf] }
  0x44   :  { %933 = vmatpush.bf16.msrb.mxu1 %v1340_v20  ;;  %v1289_v51 = vld [vmem:[#allocation5 + $0x130] sm:$0xf0]  ;;  %v1721_v52 = vld [vmem:[#allocation5 + $0x224] sm:$0xf]  ;;  %v1164_v56 = vor.u32 %v1657_v47, %v1161_v48  ;;  %v1392_v20 = vor.u32 %v1716_v10, %v1391_v6  ;;  %v1744_v29 = vld [vmem:[#allocation5 + $0x2d4] sm:$0xf0] }
  0x45   :  { %946 = vmatpush.bf16.msrb.mxu2 %v1468_v21  ;;  %v1417_v53 = vld [vmem:[#allocation5 + $0x230] sm:$0xf0]  ;;  %v1753_v54 = vld [vmem:[#allocation5 + $0x324] sm:$0xf]  ;;  %v1292_v59 = vor.u32 %v1689_v49, %v1289_v51  ;;  %v1520_v21 = vor.u32 %v1748_v12, %v1519_v11  ;;  %v1631_v30 = vld [vmem:[#allocation5 + $0x3c8] sm:$0xf] }
  0x46   :  { %959 = vmatpush.bf16.msrb.mxu3 %v1596_v26  ;;  %v1545_v55 = vld [vmem:[#allocation5 + $0x330] sm:$0xf0]  ;;  %v1653_v57 = vld [vmem:[#allocation5 + $0x4] sm:$0xf]  ;;  %v1420_v60 = vor.u32 %v1721_v52, %v1417_v53  ;;  %v1648_v26 = vor.u32 %v1780_v17, %v1647_v16  ;;  %v1776_v31 = vld [vmem:[#allocation5 + $0x3d4] sm:$0xf0] }
  0x47   :  { %921 = vmatpush.bf16.msrb.mxu0 %v1196_v32  ;;  %v1145_v58 = vld [vmem:[#allocation5 + $0x10] sm:$0xf0]  ;;  %v1685_v61 = vld [vmem:[#allocation5 + $0x104] sm:$0xf]  ;;  %v1548_v0 = vor.u32 %v1753_v54, %v1545_v55  ;;  %v1248_v32 = vor.u32 %v1680_v23, %v1247_v22  ;;  %v1231_v35 = vld [vmem:[#allocation5 + $0xa8] sm:$0xf] }
  0x48   :  { %934 = vmatpush.bf16.msrb.mxu1 %v1324_v33  ;;  %v1273_v62 = vld [vmem:[#allocation5 + $0x110] sm:$0xf0]  ;;  %v1717_v63 = vld [vmem:[#allocation5 + $0x204] sm:$0xf]  ;;  %v1148_v7 = vor.u32 %v1653_v57, %v1145_v58  ;;  %v1376_v33 = vor.u32 %v1712_v27, %v1375_v24  ;;  %v1676_v36 = vld [vmem:[#allocation5 + $0xb4] sm:$0xf0] }
  0x49   :  { %947 = vmatpush.bf16.msrb.mxu2 %v1452_v34  ;;  %v1401_v1 = vld [vmem:[#allocation5 + $0x210] sm:$0xf0]  ;;  %v1749_v2 = vld [vmem:[#allocation5 + $0x304] sm:$0xf]  ;;  %v1276_v13 = vor.u32 %v1685_v61, %v1273_v62  ;;  %v1504_v34 = vor.u32 %v1744_v29, %v1503_v28  ;;  %v1359_v37 = vld [vmem:[#allocation5 + $0x1a8] sm:$0xf] }
  0x4a   :  { %960 = vmatpush.bf16.msrb.mxu3 %v1580_v38  ;;  %v1529_v3 = vld [vmem:[#allocation5 + $0x310] sm:$0xf0]  ;;  %v1404_v14 = vor.u32 %v1717_v63, %v1401_v1  ;;  %v1632_v38 = vor.u32 %v1776_v31, %v1631_v30  ;;  %v1708_v39 = vld [vmem:[#allocation5 + $0x1b4] sm:$0xf0]  ;;  %v1487_v40 = vld [vmem:[#allocation5 + $0x2a8] sm:$0xf] }
  0x4b   :  { %922 = vmatpush.bf16.msrb.mxu0 %v1180_v44  ;;  %v1532_v18 = vor.u32 %v1749_v2, %v1529_v3  ;;  %v1740_v41 = vld [vmem:[#allocation5 + $0x2b4] sm:$0xf0]  ;;  %v1615_v42 = vld [vmem:[#allocation5 + $0x3a8] sm:$0xf]  ;;  %v1232_v44 = vor.u32 %v1676_v36, %v1231_v35 }
  0x4c   :  { %935 = vmatpush.bf16.msrb.mxu1 %v1308_v45  ;;  %v1772_v43 = vld [vmem:[#allocation5 + $0x3b4] sm:$0xf0]  ;;  %v1360_v45 = vor.u32 %v1708_v39, %v1359_v37  ;;  %v1215_v47 = vld [vmem:[#allocation5 + $0x88] sm:$0xf] }
  0x4d   :  { %948 = vmatpush.bf16.msrb.mxu2 %v1436_v46  ;;  %v1488_v46 = vor.u32 %v1740_v41, %v1487_v40  ;;  %v1672_v48 = vld [vmem:[#allocation5 + $0x94] sm:$0xf0]  ;;  %v1343_v49 = vld [vmem:[#allocation5 + $0x188] sm:$0xf] }
  0x4e   :  { %961 = vmatpush.bf16.msrb.mxu3 %v1564_v50  ;;  %v1616_v50 = vor.u32 %v1772_v43, %v1615_v42  ;;  %v1704_v51 = vld [vmem:[#allocation5 + $0x194] sm:$0xf0]  ;;  %v1471_v52 = vld [vmem:[#allocation5 + $0x288] sm:$0xf] }
  0x4f   :  { %923 = vmatpush.bf16.msrb.mxu0 %v1164_v56  ;;  %v1736_v53 = vld [vmem:[#allocation5 + $0x294] sm:$0xf0]  ;;  %v1599_v54 = vld [vmem:[#allocation5 + $0x388] sm:$0xf]  ;;  %v1216_v56 = vor.u32 %v1672_v48, %v1215_v47  ;;  %v1344_v57 = vor.u32 %v1704_v51, %v1343_v49  ;;  %v1393_v48 = vld [vmem:[#allocation5 + $0x1f8] sm:$0xf0] }
  0x50   :  { %936 = vmatpush.bf16.msrb.mxu1 %v1292_v59  ;;  %v1768_v55 = vld [vmem:[#allocation5 + $0x394] sm:$0xf0]  ;;  %v1472_v58 = vor.u32 %v1736_v53, %v1471_v52  ;;  %v1199_v59 = vld [vmem:[#allocation5 + $0x68] sm:$0xf]  ;;  %v1746_v49 = vld [vmem:[#allocation5 + $0x2ec] sm:$0xf] }
  0x51   :  { %949 = vmatpush.bf16.msrb.mxu2 %v1420_v60  ;;  %v1668_v60 = vld [vmem:[#allocation5 + $0x74] sm:$0xf0]  ;;  %v1327_v61 = vld [vmem:[#allocation5 + $0x168] sm:$0xf]  ;;  %v1600_v62 = vor.u32 %v1768_v55, %v1599_v54  ;;  %v1778_v53 = vld [vmem:[#allocation5 + $0x3ec] sm:$0xf] }
  0x52   :  { %962 = vmatpush.bf16.msrb.mxu3 %v1548_v0  ;;  %v1700_v63 = vld [vmem:[#allocation5 + $0x174] sm:$0xf0]  ;;  %v1455_v0 = vld [vmem:[#allocation5 + $0x268] sm:$0xf]  ;;  %v1200_v4 = vor.u32 %v1668_v60, %v1199_v59  ;;  %v1649_v54 = vld [vmem:[#allocation5 + $0x3f8] sm:$0xf0] }
  0x53   :  { %924 = vmatpush.bf16.msrb.mxu0 %v1148_v7  ;;  %v1732_v1 = vld [vmem:[#allocation5 + $0x274] sm:$0xf0]  ;;  %v1583_v2 = vld [vmem:[#allocation5 + $0x368] sm:$0xf]  ;;  %v1328_v5 = vor.u32 %v1700_v63, %v1327_v61  ;;  %v1678_v59 = vld [vmem:[#allocation5 + $0xcc] sm:$0xf] }
  0x54   :  { %937 = vmatpush.bf16.msrb.mxu1 %v1276_v13  ;;  %v1764_v3 = vld [vmem:[#allocation5 + $0x374] sm:$0xf0]  ;;  %v1456_v6 = vor.u32 %v1732_v1, %v1455_v0  ;;  %v1183_v7 = vld [vmem:[#allocation5 + $0x48] sm:$0xf]  ;;  %v1249_v60 = vld [vmem:[#allocation5 + $0xd8] sm:$0xf0] }
  0x55   :  { %950 = vmatpush.bf16.msrb.mxu2 %v1404_v14  ;;  %v1664_v10 = vld [vmem:[#allocation5 + $0x54] sm:$0xf0]  ;;  %v1311_v11 = vld [vmem:[#allocation5 + $0x148] sm:$0xf]  ;;  %v1584_v12 = vor.u32 %v1764_v3, %v1583_v2  ;;  %v1710_v61 = vld [vmem:[#allocation5 + $0x1cc] sm:$0xf] }
  0x56   :  { %963 = vmatpush.bf16.msrb.mxu3 %v1532_v18  ;;  %925 = vmatmul.bf16.vlgmr.msrb.gmra.mxu0 %v2030_v9  ;;  %v1696_v13 = vld [vmem:[#allocation5 + $0x154] sm:$0xf0]  ;;  %v1439_v14 = vld [vmem:[#allocation5 + $0x248] sm:$0xf]  ;;  %v1377_v63 = vld [vmem:[#allocation5 + $0x1d8] sm:$0xf0] }
  0x57   :  { %969 = vmatpush.bf16.msra.mxu0 %v1264_v19  ;;  %938 = vmatmul.bf16.vlgmr.msrb.gmra.mxu1 %v2037_v25  ;;  %v1728_v16 = vld [vmem:[#allocation5 + $0x254] sm:$0xf0]  ;;  %v1567_v17 = vld [vmem:[#allocation5 + $0x348] sm:$0xf]  ;;  %v1184_v19 = vor.u32 %v1664_v10, %v1183_v7  ;;  %v1742_v0 = vld [vmem:[#allocation5 + $0x2cc] sm:$0xf] }
  0x58   :  { %982 = vmatpush.bf16.msra.mxu1 %v1392_v20  ;;  %951 = vmatmul.bf16.vlgmr.msrb.gmra.mxu2 %v2028_v8  ;;  %v1760_v18 = vld [vmem:[#allocation5 + $0x354] sm:$0xf0]  ;;  %v1312_v20 = vor.u32 %v1696_v13, %v1311_v11  ;;  %v1167_v22 = vld [vmem:[#allocation5 + $0x28] sm:$0xf]  ;;  %v1505_v1 = vld [vmem:[#allocation5 + $0x2d8] sm:$0xf0] }
  0x59   :  { %995 = vmatpush.bf16.msra.mxu2 %v1520_v21  ;;  %964 = vmatmul.bf16.vlgmr.msrb.gmra.mxu3 %v2032_v15  ;;  %v1440_v21 = vor.u32 %v1728_v16, %v1439_v14  ;;  %v1660_v23 = vld [vmem:[#allocation5 + $0x34] sm:$0xf0]  ;;  %v1295_v24 = vld [vmem:[#allocation5 + $0x128] sm:$0xf]  ;;  %v1774_v2 = vld [vmem:[#allocation5 + $0x3cc] sm:$0xf] }
  0x5a   :  { %1008 = vmatpush.bf16.msra.mxu3 %v1648_v26  ;;  %v1568_v26 = vor.u32 %v1760_v18, %v1567_v17  ;;  %v1692_v27 = vld [vmem:[#allocation5 + $0x134] sm:$0xf0]  ;;  %v1423_v28 = vld [vmem:[#allocation5 + $0x228] sm:$0xf]  ;;  %v1633_v3 = vld [vmem:[#allocation5 + $0x3d8] sm:$0xf0] }
  0x5b   :  { %970 = vmatpush.bf16.msra.mxu0 %v1248_v32  ;;  %v1724_v29 = vld [vmem:[#allocation5 + $0x234] sm:$0xf0]  ;;  %v1551_v30 = vld [vmem:[#allocation5 + $0x328] sm:$0xf]  ;;  %v1168_v32 = vor.u32 %v1660_v23, %v1167_v22  ;;  %v1296_v35 = vor.u32 %v1692_v27, %v1295_v24  ;;  %v1674_v7 = vld [vmem:[#allocation5 + $0xac] sm:$0xf] }
  0x5c   :  { %983 = vmatpush.bf16.msra.mxu1 %v1376_v33  ;;  %v1756_v31 = vld [vmem:[#allocation5 + $0x334] sm:$0xf0]  ;;  %v1151_v33 = vld [vmem:[#allocation5 + $0x8] sm:$0xf]  ;;  %v1424_v36 = vor.u32 %v1724_v29, %v1423_v28  ;;  %v1233_v10 = vld [vmem:[#allocation5 + $0xb8] sm:$0xf0] }
  0x5d   :  { %996 = vmatpush.bf16.msra.mxu2 %v1504_v34  ;;  %v1656_v34 = vld [vmem:[#allocation5 + $0x14] sm:$0xf0]  ;;  %v1279_v37 = vld [vmem:[#allocation5 + $0x108] sm:$0xf]  ;;  %v1552_v40 = vor.u32 %v1756_v31, %v1551_v30  ;;  %v1706_v11 = vld [vmem:[#allocation5 + $0x1ac] sm:$0xf] }
  0x5e   :  { %1009 = vmatpush.bf16.msra.mxu3 %v1632_v38  ;;  %v1688_v38 = vld [vmem:[#allocation5 + $0x114] sm:$0xf0]  ;;  %v1407_v39 = vld [vmem:[#allocation5 + $0x208] sm:$0xf]  ;;  %v1152_v47 = vor.u32 %v1656_v34, %v1151_v33  ;;  %v1361_v13 = vld [vmem:[#allocation5 + $0x1b8] sm:$0xf0] }
  0x5f   :  { %971 = vmatpush.bf16.msra.mxu0 %v1232_v44  ;;  %v1720_v41 = vld [vmem:[#allocation5 + $0x214] sm:$0xf0]  ;;  %v1535_v42 = vld [vmem:[#allocation5 + $0x308] sm:$0xf]  ;;  %v1682_v44 = vld [vmem:[#allocation5 + $0xec] sm:$0xf]  ;;  %v1280_v51 = vor.u32 %v1688_v38, %v1279_v37 }
  0x60   :  { %984 = vmatpush.bf16.msra.mxu1 %v1360_v45  ;;  %v1752_v43 = vld [vmem:[#allocation5 + $0x314] sm:$0xf0]  ;;  %v1265_v45 = vld [vmem:[#allocation5 + $0xf8] sm:$0xf0]  ;;  %v1408_v52 = vor.u32 %v1720_v41, %v1407_v39  ;;  %v1738_v14 = vld [vmem:[#allocation5 + $0x2ac] sm:$0xf] }
  0x61   :  { %997 = vmatpush.bf16.msra.mxu2 %v1488_v46  ;;  %v1714_v46 = vld [vmem:[#allocation5 + $0x1ec] sm:$0xf]  ;;  %v1536_v55 = vor.u32 %v1752_v43, %v1535_v42  ;;  %v1489_v16 = vld [vmem:[#allocation5 + $0x2b8] sm:$0xf0] }
  0x62   :  { %1010 = vmatpush.bf16.msra.mxu3 %v1616_v50  ;;  %v1521_v50 = vld [vmem:[#allocation5 + $0x2f8] sm:$0xf0]  ;;  %v1770_v17 = vld [vmem:[#allocation5 + $0x3ac] sm:$0xf] }
  0x63   :  { %972 = vmatpush.bf16.msra.mxu0 %v1216_v56  ;;  %v1268_v56 = vor.u32 %v1682_v44, %v1265_v45  ;;  %v1617_v18 = vld [vmem:[#allocation5 + $0x3b8] sm:$0xf0]  ;;  %v1670_v22 = vld [vmem:[#allocation5 + $0x8c] sm:$0xf] }
  0x64   :  { %985 = vmatpush.bf16.msra.mxu1 %v1344_v57  ;;  %v1396_v57 = vor.u32 %v1714_v46, %v1393_v48  ;;  %v1217_v23 = vld [vmem:[#allocation5 + $0x98] sm:$0xf0]  ;;  %v1702_v24 = vld [vmem:[#allocation5 + $0x18c] sm:$0xf] }
  0x65   :  { %998 = vmatpush.bf16.msra.mxu2 %v1472_v58  ;;  %v1524_v58 = vor.u32 %v1746_v49, %v1521_v50  ;;  %v1345_v27 = vld [vmem:[#allocation5 + $0x198] sm:$0xf0]  ;;  %v1734_v28 = vld [vmem:[#allocation5 + $0x28c] sm:$0xf] }
  0x66   :  { %1011 = vmatpush.bf16.msra.mxu3 %v1600_v62  ;;  %v1652_v62 = vor.u32 %v1778_v53, %v1649_v54  ;;  %v1473_v29 = vld [vmem:[#allocation5 + $0x298] sm:$0xf0]  ;;  %v1766_v30 = vld [vmem:[#allocation5 + $0x38c] sm:$0xf]  ;;  %v1348_v33 = vor.u32 %v1702_v24, %v1345_v27 }
  0x67   :  { %973 = vmatpush.bf16.msra.mxu0 %v1200_v4  ;;  %v1252_v4 = vor.u32 %v1678_v59, %v1249_v60  ;;  %v1601_v31 = vld [vmem:[#allocation5 + $0x398] sm:$0xf0]  ;;  %v1476_v34 = vor.u32 %v1734_v28, %v1473_v29  ;;  %v1698_v37 = vld [vmem:[#allocation5 + $0x16c] sm:$0xf] }
  0x68   :  { %986 = vmatpush.bf16.msra.mxu1 %v1328_v5  ;;  %v1380_v5 = vor.u32 %v1710_v61, %v1377_v63  ;;  %v1604_v38 = vor.u32 %v1766_v30, %v1601_v31  ;;  %v1329_v39 = vld [vmem:[#allocation5 + $0x178] sm:$0xf0]  ;;  %v1762_v42 = vld [vmem:[#allocation5 + $0x36c] sm:$0xf] }
  0x69   :  { %999 = vmatpush.bf16.msra.mxu2 %v1456_v6  ;;  %v1508_v6 = vor.u32 %v1742_v0, %v1505_v1  ;;  %v1457_v41 = vld [vmem:[#allocation5 + $0x278] sm:$0xf0]  ;;  %v1332_v45 = vor.u32 %v1698_v37, %v1329_v39  ;;  %v1694_v49 = vld [vmem:[#allocation5 + $0x14c] sm:$0xf] }
  0x6a   :  { %1012 = vmatpush.bf16.msra.mxu3 %v1584_v12  ;;  %v1636_v12 = vor.u32 %v1774_v2, %v1633_v3  ;;  %v1585_v43 = vld [vmem:[#allocation5 + $0x378] sm:$0xf0]  ;;  %v1758_v54 = vld [vmem:[#allocation5 + $0x34c] sm:$0xf] }
  0x6b   :  { %974 = vmatpush.bf16.msra.mxu0 %v1184_v19  ;;  %v1236_v19 = vor.u32 %v1674_v7, %v1233_v10  ;;  %v1185_v48 = vld [vmem:[#allocation5 + $0x58] sm:$0xf0]  ;;  %v1588_v50 = vor.u32 %v1762_v42, %v1585_v43  ;;  %v1658_v59 = vld [vmem:[#allocation5 + $0x2c] sm:$0xf] }
  0x6c   :  { %987 = vmatpush.bf16.msra.mxu1 %v1312_v20  ;;  %v1364_v20 = vor.u32 %v1706_v11, %v1361_v13  ;;  %v1441_v53 = vld [vmem:[#allocation5 + $0x258] sm:$0xf0]  ;;  %v1690_v61 = vld [vmem:[#allocation5 + $0x12c] sm:$0xf] }
  0x6d   :  { %1000 = vmatpush.bf16.msra.mxu2 %v1440_v21  ;;  %v1492_v21 = vor.u32 %v1738_v14, %v1489_v16  ;;  %v1169_v60 = vld [vmem:[#allocation5 + $0x38] sm:$0xf0]  ;;  %v1722_v0 = vld [vmem:[#allocation5 + $0x22c] sm:$0xf] }
  0x6e   :  { %1013 = vmatpush.bf16.msra.mxu3 %v1568_v26  ;;  %v1620_v26 = vor.u32 %v1770_v17, %v1617_v18  ;;  %v1297_v63 = vld [vmem:[#allocation5 + $0x138] sm:$0xf0]  ;;  %v1754_v2 = vld [vmem:[#allocation5 + $0x32c] sm:$0xf] }
  0x6f   :  { %975 = vmatpush.bf16.msra.mxu0 %v1168_v32  ;;  %v1220_v32 = vor.u32 %v1670_v22, %v1217_v23  ;;  %v1425_v1 = vld [vmem:[#allocation5 + $0x238] sm:$0xf0]  ;;  %v1654_v7 = vld [vmem:[#allocation5 + $0xc] sm:$0xf]  ;;  %v215_v23 = vld [vmem:[#allocation7] sm:$0xf] }
  0x70   :  { %988 = vmatpush.bf16.msra.mxu1 %v1296_v35  ;;  %v1666_v35 = vld [vmem:[#allocation5 + $0x6c] sm:$0xf]  ;;  %v1553_v3 = vld [vmem:[#allocation5 + $0x338] sm:$0xf0]  ;;  %v217_v24 = vperm.slane %v215_v23, 0 }
  0x71   :  { %1001 = vmatpush.bf16.msra.mxu2 %v1424_v36  ;;  %v1201_v36 = vld [vmem:[#allocation5 + $0x78] sm:$0xf0]  ;;  %v1686_v11 = vld [vmem:[#allocation5 + $0x10c] sm:$0xf] }
  0x72   :  { %1014 = vmatpush.bf16.msra.mxu3 %v1552_v40  ;;  %v1730_v40 = vld [vmem:[#allocation5 + $0x26c] sm:$0xf]  ;;  %v1204_v44 = vor.u32 %v1666_v35, %v1201_v36  ;;  %v1153_v10 = vld [vmem:[#allocation5 + $0x18] sm:$0xf0] }
  0x73   :  { %976 = vmatpush.bf16.msra.mxu0 %v1152_v47  ;;  %v1460_v46 = vor.u32 %v1730_v40, %v1457_v41  ;;  %v1662_v47 = vld [vmem:[#allocation5 + $0x4c] sm:$0xf]  ;;  %v1281_v13 = vld [vmem:[#allocation5 + $0x118] sm:$0xf0] }
  0x74   :  { %989 = vmatpush.bf16.msra.mxu1 %v1280_v51  ;;  %v1313_v51 = vld [vmem:[#allocation5 + $0x158] sm:$0xf0]  ;;  %v1718_v14 = vld [vmem:[#allocation5 + $0x20c] sm:$0xf] }
  0x75   :  { %1002 = vmatpush.bf16.msra.mxu2 %v1408_v52  ;;  %v1726_v52 = vld [vmem:[#allocation5 + $0x24c] sm:$0xf]  ;;  %v1409_v16 = vld [vmem:[#allocation5 + $0x218] sm:$0xf0] }
  0x76   :  { %1015 = vmatpush.bf16.msra.mxu3 %v1536_v55  ;;  %977 = vmatmul.bf16.vlgmr.msra.gmra.mxu0 %v2030_v9  ;;  %v1569_v55 = vld [vmem:[#allocation5 + $0x358] sm:$0xf0]  ;;  %v1750_v17 = vld [vmem:[#allocation5 + $0x30c] sm:$0xf] }
  0x77   :  { %1021 = vmatpush.bf16.msrb.mxu0 %v1268_v56  ;;  %990 = vmatmul.bf16.vlgmr.msra.gmra.mxu1 %v2037_v25  ;;  %v1188_v56 = vor.u32 %v1662_v47, %v1185_v48  ;;  %v1537_v18 = vld [vmem:[#allocation5 + $0x318] sm:$0xf0]  ;;  %v219_v47 = vperm.slane %v215_v23, 2 }
  0x78   :  { %1034 = vmatpush.bf16.msrb.mxu1 %v1396_v57  ;;  %1003 = vmatmul.bf16.vlgmr.msra.gmra.mxu2 %v2028_v8  ;;  %v1316_v57 = vor.u32 %v1694_v49, %v1313_v51  ;;  %v1540_v22 = vor.u32 %v1750_v17, %v1537_v18 }
  0x79   :  { %1047 = vmatpush.bf16.msrb.mxu2 %v1524_v58  ;;  %1016 = vmatmul.bf16.vlgmr.msra.gmra.mxu3 %v2032_v15  ;;  %v1444_v58 = vor.u32 %v1726_v52, %v1441_v53 }
  0x7a   :  { %1060 = vmatpush.bf16.msrb.mxu3 %v1652_v62  ;;  %v1572_v62 = vor.u32 %v1758_v54, %v1569_v55 }
  0x7b   :  { %1022 = vmatpush.bf16.msrb.mxu0 %v1252_v4  ;;  %v1172_v4 = vor.u32 %v1658_v59, %v1169_v60 }
  0x7c   :  { %1035 = vmatpush.bf16.msrb.mxu1 %v1380_v5  ;;  %v1300_v5 = vor.u32 %v1690_v61, %v1297_v63 }
  0x7d   :  { %1048 = vmatpush.bf16.msrb.mxu2 %v1508_v6  ;;  %v1428_v6 = vor.u32 %v1722_v0, %v1425_v1 }
  0x7e   :  { %1061 = vmatpush.bf16.msrb.mxu3 %v1636_v12  ;;  %v1556_v12 = vor.u32 %v1754_v2, %v1553_v3  ;;  %v220_v2 = vperm.slane %v215_v23, 3 }
  0x7f   :  { %1023 = vmatpush.bf16.msrb.mxu0 %v1236_v19  ;;  %v1156_v19 = vor.u32 %v1654_v7, %v1153_v10 }
  0x80   :  { %1036 = vmatpush.bf16.msrb.mxu1 %v1364_v20  ;;  %v1284_v20 = vor.u32 %v1686_v11, %v1281_v13 }
  0x81   :  { %1049 = vmatpush.bf16.msrb.mxu2 %v1492_v21  ;;  %v1412_v21 = vor.u32 %v1718_v14, %v1409_v16 }
  0x82   :  { %1062 = vmatpush.bf16.msrb.mxu3 %v1620_v26 }
  0x83   :  { %1024 = vmatpush.bf16.msrb.mxu0 %v1220_v32 }
  0x84   :  { %1037 = vmatpush.bf16.msrb.mxu1 %v1348_v33 }
  0x85   :  { %1050 = vmatpush.bf16.msrb.mxu2 %v1476_v34 }
  0x86   :  { %1063 = vmatpush.bf16.msrb.mxu3 %v1604_v38 }
  0x87   :  { %1025 = vmatpush.bf16.msrb.mxu0 %v1204_v44 }
  0x88   :  { %1038 = vmatpush.bf16.msrb.mxu1 %v1332_v45 }
  0x89   :  { %1051 = vmatpush.bf16.msrb.mxu2 %v1460_v46 }
  0x8a   :  { %1064 = vmatpush.bf16.msrb.mxu3 %v1588_v50 }
  0x8b   :  { %1026 = vmatpush.bf16.msrb.mxu0 %v1188_v56 }
  0x8c   :  { %1039 = vmatpush.bf16.msrb.mxu1 %v1316_v57 }
  0x8d   :  { %1052 = vmatpush.bf16.msrb.mxu2 %v1444_v58 }
  0x8e   :  { %1065 = vmatpush.bf16.msrb.mxu3 %v1572_v62  ;;  %v1079_v62 = vld [vmem:[#allocation8] sm:$0xff] }
  0x8f   :  { %1027 = vmatpush.bf16.msrb.mxu0 %v1172_v4 }
  0x90   :  { %1040 = vmatpush.bf16.msrb.mxu1 %v1300_v5 }
  0x91   :  { %1053 = vmatpush.bf16.msrb.mxu2 %v1428_v6 }
  0x92   :  { %1066 = vmatpush.bf16.msrb.mxu3 %v1556_v12 }
  0x93   :  { %1028 = vmatpush.bf16.msrb.mxu0 %v1156_v19 }
  0x94   :  { %1041 = vmatpush.bf16.msrb.mxu1 %v1284_v20  ;;  %v1080_v20 = vld [vmem:[#allocation8 + $0x8] sm:$0xff] }
  0x95   :  { %1054 = vmatpush.bf16.msrb.mxu2 %v1412_v21 }
  0x96   :  { %1067 = vmatpush.bf16.msrb.mxu3 %v1540_v22  ;;  %1029 = vmatmul.bf16.vlgmr.msrb.gmra.mxu0 %v2030_v9 }
  0x97   :  { %1042 = vmatmul.bf16.vlgmr.msrb.gmra.mxu1 %v2037_v25  ;;  %v218_v25 = vperm.slane %v215_v23, 1 }
  0x98   :  { %1055 = vmatmul.bf16.vlgmr.msrb.gmra.mxu2 %v2028_v8 }
  0x99   :  { %1068 = vmatmul.bf16.vlgmr.msrb.gmra.mxu3 %v2032_v15 }
  0xb6   :  { %v874_v26 = vpop.f32.mrf.mxu0 }
  0xb7   :  { %v875_v27 = vadd.f32 %v874_v26, %v217_v24 }
  0xba   :  { %v887_v28 = vpop.f32.mrf.mxu1 }
  0xbb   :  { %v888_v29 = vadd.f32 %v887_v28, %v875_v27 }
  0xbd   :  { %v900_v30 = vpop.f32.mrf.mxu2 }
  0xbe   :  { %v901_v31 = vadd.f32 %v900_v30, %v888_v29  ;;  %v913_v32 = vpop.f32.mrf.mxu3  ;;  %v876_v33 = vpop.f32.mrf.mxu0 }
  0xc0   :  { %v914_v34 = vadd.f32 %v913_v32, %v901_v31 }
  0xc2   :  { %1087 = vst [vmem:[#allocation11] sm:$0xff] %v914_v34  ;;  %v889_v35 = vpop.f32.mrf.mxu1 }
  0xc5   :  { %v902_v9 = vpop.f32.mrf.mxu2 }
  0xc6   :  { %v915_v36 = vpop.f32.mrf.mxu3 }
  0xd3   :  { %v926_v37 = vpop.f32.mrf.mxu0 }
  0xd4   :  { %v927_v8 = vadd.f32 %v926_v37, %v218_v25  ;;  %v939_v38 = vpop.f32.mrf.mxu1 }
  0xd6   :  { %v940_v15 = vadd.f32 %v939_v38, %v927_v8 }
  0xdb   :  { %v952_v39 = vpop.f32.mrf.mxu2  ;;  %v928_v43 = vpop.f32.mrf.mxu0 }
  0xdc   :  { %v953_v40 = vadd.f32 %v952_v39, %v940_v15  ;;  %v965_v41 = vpop.f32.mrf.mxu3  ;;  %v941_v44 = vpop.f32.mrf.mxu1 }
  0xde   :  { %v966_v42 = vadd.f32 %v965_v41, %v953_v40 }
  0xe0   :  { %1088 = vst [vmem:[#allocation11 + $0x8] sm:$0xff] %v966_v42 }
  0xe1   :  { %1112 = dma.vmem_to_hbm [thread:$0]  %s1108_s3, 256, %s1110_s19, [#allocation12]  }
  0xe3   :  { %v954_v45 = vpop.f32.mrf.mxu2 }
  0xe4   :  { %v967_v46 = vpop.f32.mrf.mxu3 }
  0xf3   :  { %v978_v48 = vpop.f32.mrf.mxu0 }
  0xf4   :  { %v979_v49 = vadd.f32 %v978_v48, %v219_v47  ;;  %v991_v50 = vpop.f32.mrf.mxu1 }
  0xf6   :  { %v992_v51 = vadd.f32 %v991_v50, %v979_v49 }
  0xfb   :  { %v1004_v52 = vpop.f32.mrf.mxu2  ;;  %v980_v56 = vpop.f32.mrf.mxu0 }
  0xfc   :  { %v1005_v53 = vadd.f32 %v1004_v52, %v992_v51  ;;  %v1017_v54 = vpop.f32.mrf.mxu3  ;;  %v993_v57 = vpop.f32.mrf.mxu1 }
  0xfe   :  { %v1018_v55 = vadd.f32 %v1017_v54, %v1005_v53 }
 0x100   :  { %v1073_v58 = vmul.f32 0.5, %v1018_v55  ;;  %1089 = vst [vmem:[#allocation13] sm:$0xff] %v1018_v55 }
 0x102   :  { %v1075_v59 = vmul.f32 1.442695, %v1073_v58 }
 0x103   :  { %v1006_v60 = vpop.f32.mrf.mxu2 }
 0x104   :  { %1790 = vpow2.f32 %v1075_v59  ;;  %v1019_v61 = vpop.f32.mrf.mxu3 }
 0x10a   :  { %v1791_v63 = vpop.eup %1790 }
 0x10b   :  { %v1081_v0 = vmul.f32 %v1791_v63, %v1079_v62 }
 0x10d   :  { %v1083_v1 = vadd.f32 %v1081_v0, %v914_v34 }
 0x10f   :  { %1085 = vst [vmem:[#allocation10] sm:$0xff] %v1083_v1 }
 0x113   :  { %v1030_v3 = vpop.f32.mrf.mxu0 }
 0x114   :  { %v1031_v4 = vadd.f32 %v1030_v3, %v220_v2  ;;  %v1043_v5 = vpop.f32.mrf.mxu1 }
 0x116   :  { %v1044_v6 = vadd.f32 %v1043_v5, %v1031_v4 }
 0x11b   :  { %v1056_v7 = vpop.f32.mrf.mxu2  ;;  %v1032_v12 = vpop.f32.mrf.mxu0 }
 0x11c   :  { %v1057_v10 = vadd.f32 %v1056_v7, %v1044_v6  ;;  %v1069_v11 = vpop.f32.mrf.mxu3  ;;  %v1045_v13 = vpop.f32.mrf.mxu1 }
 0x11e   :  { %v1070_v14 = vadd.f32 %v1069_v11, %v1057_v10 }
 0x120   :  { %v1074_v16 = vmul.f32 0.5, %v1070_v14  ;;  %1090 = vst [vmem:[#allocation13 + $0x8] sm:$0xff] %v1070_v14 }
 0x121   :  { %1123 = dma.vmem_to_hbm [thread:$0]  %s1119_s20, 256, %s1121_s23, [#allocation12]  }
 0x122   :  { %v1077_v17 = vmul.f32 1.442695, %v1074_v16 }
 0x123   :  { %v1058_v18 = vpop.f32.mrf.mxu2 }
 0x124   :  { %1792 = vpow2.f32 %v1077_v17  ;;  %v1071_v19 = vpop.f32.mrf.mxu3 }
 0x12a   :  { %v1793_v21 = vpop.eup %1792 }
 0x12b   :  { %v1082_v22 = vmul.f32 %v1793_v21, %v1080_v20 }
 0x12d   :  { %v1084_v23 = vadd.f32 %v1082_v22, %v966_v42 }
 0x12f   :  { %1086 = vst [vmem:[#allocation10 + $0x8] sm:$0xff] %v1084_v23 }
 0x130   :  { %1101 = dma.vmem_to_hbm [thread:$0]  %s1097_s25, 256, %s1099_s27, [#allocation4]  }
 0x131   :  { %1968 = dma.done.wait [#allocation4], 256  }
 0x132   :  { %1969 = vsyncadd [#allocation4], 4294967040 }
 0x133   :  { %1970 = dma.done.wait [#allocation12], 512  }
 0x134   :  { %1971 = vsyncadd [#allocation12], 4294966784 }
 0x135   :  { %1136 = vsyncpa [#allocation3], 1 }
 0x136   :  { %1137 = vsyncpa [#allocation6], 1 }
 0x137   :  { %1138 = vsyncpa [#allocation9], 1 }
 0x138   :  { %1139 = vsyncpa [#allocation4], 1 }
 0x139   :  { %1140 = vsyncpa [#allocation12], 1 }

</bundles_post_ra>
